<compile_context>
chip_gen: v6e
topology: v6e:2x2x1
jax: 0.10.0
libtpu: 0.0.40
codegen_flags: <defaults>
</compile_context>

<pallas_src>
import functools

import numpy as np
import jax
import jax.numpy as jnp
from jax.experimental import pallas as pl
from jax.experimental.pallas import tpu as pltpu

# Fixed module hyper-parameters (AudInitStage).
CONV_K, CONV_S, CONV_P = 49, 4, 24
POOL_K, POOL_S, POOL_P = 9, 4, 4
ROW_T = 8                              # conv outputs produced per coarse input row
ROW_W = 128                            # raw samples per coarse row (lane-dense, 4x duplication)
KP = 52                                # conv taps zero-padded 49 -> 52 (multiple of CONV_S)
N_PHASE = ROW_T + POOL_K - POOL_S      # 13: phases 0..12 cover conv times 8v .. 8v+12
# Max lane touched: 4*(N_PHASE-1) + KP - 1 = 99 < ROW_W = 128  (extended phases fit a row).


def _phase_lhs(c_ref, p, r, c_in):
    """bf16 conv window for phase p: rows = coarse time, lanes = (r, tap, c_in)."""
    parts = []
    for rr in range(r):
        s = (rr * ROW_W + p * CONV_S) * c_in
        parts.append(c_ref[:, s:s + KP * c_in])
    return parts[0] if r == 1 else jnp.concatenate(parts, axis=-1)


# ---------------------------------------------------------------------------
# Kernel 1: conv (phases 0..7) -> per-tile BN partial statistics (sum, sum-sq).
# ---------------------------------------------------------------------------
def _conv_stats_kernel(c_ref, w_ref, stat_ref, *, r, c_in, t_hi):
    vt = c_ref.shape[0]
    l = w_ref.shape[1]
    base = pl.program_id(0) * (ROW_T * vt)
    tcol = base + ROW_T * jax.lax.broadcasted_iota(jnp.int32, (vt, 1), 0)
    wm = w_ref[...]                                          # raw block-diag weights (bf16)

    s1 = jnp.zeros((1, l), jnp.float32)
    s2 = jnp.zeros((1, l), jnp.float32)
    for p in range(ROW_T):
        y = jnp.dot(_phase_lhs(c_ref, p, r, c_in), wm,
                    preferred_element_type=jnp.float32)      # (vt, l) = conv'[8v+p]
        valid = ((tcol + p) >= POOL_P) & ((tcol + p) < t_hi)  # real conv range only
        y = jnp.where(valid, y, 0.0)
        s1 = s1 + jnp.sum(y, axis=0, keepdims=True)
        s2 = s2 + jnp.sum(y * y, axis=0, keepdims=True)
    stat_ref[...] = jnp.concatenate([s1, s2], axis=0)[None]   # (1, 2, l)


# ---------------------------------------------------------------------------
# Kernel 2: conv (scale folded into weights) + bias + ReLU + MaxPool(9, s=4),
# emitted as even/odd pooled rows (interleaved by the wrapper's final transpose).
# ---------------------------------------------------------------------------
def _conv_bn_relu_pool_kernel(c_ref, w_ref, bias_ref, out_ref, *, r, c_in, t_hi):
    vt = c_ref.shape[0]
    base = pl.program_id(0) * (ROW_T * vt)
    tcol = base + ROW_T * jax.lax.broadcasted_iota(jnp.int32, (vt, 1), 0)
    wm = w_ref[...]                                          # scale-folded weights (bf16)
    neg = jnp.float32(-1e30)                                 # acts as -inf pool padding

    even = None                                              # pooled[2v]   = max phases 0..8
    odd = None                                               # pooled[2v+1] = max phases 4..12
    for p in range(N_PHASE):
        y = jnp.dot(_phase_lhs(c_ref, p, r, c_in), wm,
                    preferred_element_type=jnp.float32)
        valid = ((tcol + p) >= POOL_P) & ((tcol + p) < t_hi)
        y = jnp.where(valid, y, neg)
        if p < POOL_K:
            even = y if even is None else jnp.maximum(even, y)
        if p >= POOL_S:
            odd = y if odd is None else jnp.maximum(odd, y)

    bias = bias_ref[...]                                     # (1, l) f32
    out_ref[0] = jnp.maximum(even + bias, 0.0).astype(out_ref.dtype)
    out_ref[1] = jnp.maximum(odd + bias, 0.0).astype(out_ref.dtype)


# ---------------------------------------------------------------------------
# Tile-size pick from an explicit VMEM budget (v7x-safe: 64 MiB physical).
# ---------------------------------------------------------------------------
def _pick_vt(v_need, r, c_in, c_out, budget=8 * 1024 * 1024):
    l = r * c_out
    per_row = (2 * (r * ROW_W * c_in * 2)        # coarse-window block, double-buffered, bf16
               + 2 * (2 * l * 4)                 # pooled output block, double-buffered, f32
               + 8 * l * 4                       # live f32 temporaries (y / even / odd ...)
               + N_PHASE * r * KP * c_in * 2)    # phase LHS slices (bf16), generous
    vt = max(8, min(512, budget // max(per_row, 1)))
    vt = (vt // 8) * 8
    need8 = -(-v_need // 8) * 8
    return max(8, min(vt, need8))


# ---------------------------------------------------------------------------
# Wrapper
# ---------------------------------------------------------------------------
def aud_init_stage(x, weight, gamma, beta, *, eps=1e-5):
    """AudInitStage.forward: (N, C_in, H, W) NCHW -> (N, C_out, H, W_pool) NCHW."""
    n, c_in, h, w = x.shape
    c_out, c_in_w, kh, k_w = weight.shape
    assert c_in == c_in_w and kh == 1 and k_w == CONV_K
    r = n * h                                   # pass-through rows (kernel height is 1)
    l = r * c_out                               # lane-dense last dim

    t_conv = (w + 2 * CONV_P - CONV_K) // CONV_S + 1
    t_pool = (t_conv + 2 * POOL_P - POOL_K) // POOL_S + 1

    # Shifted conv time t' = t + POOL_P (left pool halo baked in); valid t' in [POOL_P, t_hi).
    t_hi = t_conv + POOL_P
    t_need = max(POOL_S * (t_pool - 1) + POOL_K, t_hi)       # t' values required
    v_need = -(-t_need // ROW_T)                             # coarse rows required

    vt = _pick_vt(v_need, r, c_in, c_out)
    n_tiles = -(-v_need // vt)
    v_total = n_tiles * vt
    row_step = ROW_T * CONV_S                                # 32 new samples per coarse row

    # ---- coarse 4x window matrix C (bf16, lanes ordered (r, sample, c_in)) --------------
    xt = jnp.transpose(x, (3, 0, 2, 1)).reshape(w, r * c_in).astype(jnp.bfloat16)
    left = CONV_P + POOL_P * CONV_S                          # 40 = conv pad + pool-left halo
    w_pad = row_step * v_total + (ROW_W - row_step)
    xp = jnp.pad(xt, ((left, w_pad - left - w), (0, 0)))
    pieces = [xp[s:s + row_step * v_total].reshape(v_total, row_step, r * c_in)
              for s in range(0, ROW_W, row_step)]
    cmat = jnp.concatenate(pieces, axis=1).reshape(v_total, ROW_W, r, c_in)
    cmat = jnp.transpose(cmat, (0, 2, 1, 3)).reshape(v_total, r * ROW_W * c_in)

    # ---- conv weights: (tap, c_in, c_out), zero-pad taps 49->52, block-diag over r -------
    # TODO(synk): for very large r (= N*H) the block-diagonal weight wastes MXU on zero
    # blocks; switch to a per-row grid axis in that regime.
    wk = jnp.transpose(weight[:, :, 0, :], (2, 1, 0)).reshape(CONV_K * c_in, c_out)
    wk = jnp.pad(wk.astype(jnp.float32), ((0, (KP - CONV_K) * c_in), (0, 0)))
    w_bd = jnp.kron(jnp.eye(r, dtype=jnp.float32), wk)       # (r*KP*c_in, l)

    ck = r * KP * c_in
    cw = r * ROW_W * c_in
    cparams = pltpu.CompilerParams(dimension_semantics=("parallel",),
                                   vmem_limit_bytes=32 * 1024 * 1024)

    # ---- kernel 1: conv + BN partial statistics (no activation written to HBM) -----------
    stats = pl.pallas_call(
        functools.partial(_conv_stats_kernel, r=r, c_in=c_in, t_hi=t_hi),
        out_shape=jax.ShapeDtypeStruct((n_tiles, 2, l), jnp.float32),
        grid=(n_tiles,),
        in_specs=[pl.BlockSpec((vt, cw), lambda j: (j, 0)),
                  pl.BlockSpec((ck, l), lambda j: (0, 0))],
        out_specs=pl.BlockSpec((1, 2, l), lambda j: (j, 0, 0)),
        compiler_params=cparams,
        cost_estimate=pl.CostEstimate(
            flops=2 * ROW_T * v_total * ck * l,
            transcendentals=0,
            bytes_accessed=2 * v_total * cw + 2 * ck * l + 4 * n_tiles * 2 * l),
    )(cmat, w_bd.astype(jnp.bfloat16))

    # ---- BN scale/bias from batch statistics (training-mode forward) ---------------------
    # TODO(synk): running_mean/running_var buffer updates are a training side effect and do
    # not affect the forward output; they are not materialized here.
    cnt = jnp.float32(t_conv * r)
    tot = jnp.sum(stats, axis=0).reshape(2, r, c_out).sum(axis=1)     # (2, c_out)
    mean = tot[0] / cnt
    var = jnp.maximum(tot[1] / cnt - mean * mean, 0.0)                # biased, like PyTorch BN
    scale_c = gamma.astype(jnp.float32) * jax.lax.rsqrt(var + eps)
    bias_c = beta.astype(jnp.float32) - mean * scale_c
    w_bn = (w_bd * jnp.tile(scale_c, (r,))[None, :]).astype(jnp.bfloat16)   # scale folded
    bias_l = jnp.tile(bias_c, (r,)).reshape(1, l)

    # ---- kernel 2: conv (recomputed, scaled) + bias + ReLU + maxpool ----------------------
    pooled = pl.pallas_call(
        functools.partial(_conv_bn_relu_pool_kernel, r=r, c_in=c_in, t_hi=t_hi),
        out_shape=jax.ShapeDtypeStruct((2, v_total, l), jnp.float32),
        grid=(n_tiles,),
        in_specs=[pl.BlockSpec((vt, cw), lambda j: (j, 0)),
                  pl.BlockSpec((ck, l), lambda j: (0, 0)),
                  pl.BlockSpec((1, l), lambda j: (0, 0))],
        out_specs=pl.BlockSpec((2, vt, l), lambda j: (0, j, 0)),
        compiler_params=cparams,
        cost_estimate=pl.CostEstimate(
            flops=2 * N_PHASE * v_total * ck * l,
            transcendentals=0,
            bytes_accessed=2 * v_total * cw + 2 * ck * l + 4 * 2 * v_total * l),
    )(cmat, w_bn, bias_l)

    # ---- interleave even/odd pooled rows + NCHW layout (one XLA pass on the small output) -
    pooled = jnp.transpose(pooled, (1, 0, 2)).reshape(2 * v_total, l)[:t_pool]
    out = pooled.reshape(t_pool, n, h, c_out)
    return jnp.transpose(out, (1, 3, 2, 0))                  # (N, C_out, H, T_pool)


# ---------------------------------------------------------------------------
# Pure-JAX reference mirroring the PyTorch module (training-mode BatchNorm).
# ---------------------------------------------------------------------------
def _reference_forward(x, weight, gamma, beta, eps=1e-5):
    conv = jax.lax.conv_general_dilated(
        x, weight, window_strides=(1, 4), padding=((0, 0), (24, 24)),
        dimension_numbers=("NCHW", "OIHW", "NCHW"),
        precision=jax.lax.Precision.HIGHEST)
    mean = jnp.mean(conv, axis=(0, 2, 3), keepdims=True)
    var = jnp.var(conv, axis=(0, 2, 3), keepdims=True)
    y = (conv - mean) * jax.lax.rsqrt(var + eps)
    y = y * gamma[None, :, None, None] + beta[None, :, None, None]
    y = jnp.maximum(y, 0.0)
    return jax.lax.reduce_window(
        y, -jnp.inf, jax.lax.max,
        window_dimensions=(1, 1, 1, 9), window_strides=(1, 1, 1, 4),
        padding=((0, 0), (0, 0), (0, 0), (4, 4)))


if __name__ == "__main__":
    key = jax.random.PRNGKey(0)
    kx, kw, kg, kb = jax.random.split(key, 4)

    # Small, module-consistent shapes: the audio stem takes a 1-channel (N, 1, 1, T) input.
    n, c_in, h, w = 2, 1, 1, 64
    c_out, k_w = 64, 49

    x = jax.random.normal(kx, (n, c_in, h, w), jnp.float32)
    weight = jax.random.normal(kw, (c_out, c_in, 1, k_w), jnp.float32) / jnp.sqrt(c_in * k_w)
    gamma = 1.0 + 0.1 * jax.random.normal(kg, (c_out,), jnp.float32)
    beta = 0.1 * jax.random.normal(kb, (c_out,), jnp.float32)

    out = aud_init_stage(x, weight, gamma, beta)
    out = jax.block_until_ready(out)

    # Expected output spatial size: W=64 -> conv: 16 -> maxpool: 4
    assert out.shape == (n, c_out, h, 4), out.shape

    ref = _reference_forward(x, weight, gamma, beta)
    # Tolerance covers bf16 input/weight quantization vs the f32 HIGHEST-precision reference.
    np.testing.assert_allclose(np.asarray(out), np.asarray(ref), rtol=2e-2, atol=3e-2)

    print("KERNEL_OK")
</pallas_src>

<mosaic_0001>
module attributes {stable_mosaic.version = 11 : i64} {
  func.func @_conv_stats_kernel(%arg0: i32, %arg1: memref<8x256xbf16, #tpu.memory_space<vmem>>, %arg2: memref<104x128xbf16, #tpu.memory_space<vmem>>, %arg3: memref<1x2x128xf32, #tpu.memory_space<vmem>>) attributes {dimension_semantics = [#tpu.dimension_semantics<parallel>], iteration_bounds = array<i64: 1>, scalar_prefetch = 0 : i64, scratch_operands = 0 : i64, tpu.core_type = #tpu.core_type<tc>, window_params = [{transform_indices = @transform_0, window_bounds = array<i64: 8, 256>}, {pipeline_mode = #tpu.pipeline_mode<synchronous>, transform_indices = @transform_1, window_bounds = array<i64: 104, 128>}, {transform_indices = @transform_2, window_bounds = array<i64: 1, 2, 128>}]} {
    %c64_i32 = arith.constant 64 : i32
    %0 = arith.muli %arg0, %c64_i32 : i32
    %1 = tpu.iota {dimensions = array<i32: 0>} : vector<8x1xi32>
    %c8_i32 = arith.constant 8 : i32
    %2 = vector.broadcast %c8_i32 : i32 to vector<8x1xi32>
    %3 = arith.muli %2, %1 : vector<8x1xi32>
    %4 = vector.broadcast %0 : i32 to vector<8x1xi32>
    %5 = arith.addi %4, %3 : vector<8x1xi32>
    %c0 = arith.constant 0 : index
    %c0_0 = arith.constant 0 : index
    %6 = vector.load %arg2[%c0, %c0_0] : memref<104x128xbf16, #tpu.memory_space<vmem>>, vector<104x128xbf16>
    %cst = arith.constant 0.000000e+00 : f32
    %7 = vector.broadcast %cst : f32 to vector<1x128xf32>
    %cst_1 = arith.constant 0.000000e+00 : f32
    %8 = vector.broadcast %cst_1 : f32 to vector<1x128xf32>
    %c0_2 = arith.constant 0 : index
    %c0_3 = arith.constant 0 : index
    %9 = vector.load %arg1[%c0_2, %c0_3] : memref<8x256xbf16, #tpu.memory_space<vmem>>, vector<8x52xbf16>
    %c0_4 = arith.constant 0 : index
    %c128 = arith.constant 128 : index
    %10 = vector.load %arg1[%c0_4, %c128] : memref<8x256xbf16, #tpu.memory_space<vmem>>, vector<8x52xbf16>
    %11 = tpu.concatenate %9, %10 in 1 : vector<8x52xbf16>, vector<8x52xbf16> -> vector<8x104xbf16>
    %cst_5 = arith.constant dense<0.000000e+00> : vector<8x128xf32>
    %12 = tpu.matmul %11, %6, %cst_5 {dimension_numbers = #tpu.dot_dimension_numbers<[1], [0], [0], [1], [0, 0, 1, 1], [], []>} : vector<8x104xbf16>, vector<104x128xbf16>, vector<8x128xf32> -> vector<8x128xf32>
    %c0_i32 = arith.constant 0 : i32
    %13 = vector.broadcast %c0_i32 : i32 to vector<8x1xi32>
    %14 = arith.addi %5, %13 : vector<8x1xi32>
    %c4_i32 = arith.constant 4 : i32
    %15 = vector.broadcast %c4_i32 : i32 to vector<8x1xi32>
    %16 = arith.cmpi sge, %14, %15 : vector<8x1xi32>
    %c0_i32_6 = arith.constant 0 : i32
    %17 = vector.broadcast %c0_i32_6 : i32 to vector<8x1xi32>
    %18 = arith.addi %5, %17 : vector<8x1xi32>
    %c20_i32 = arith.constant 20 : i32
    %19 = vector.broadcast %c20_i32 : i32 to vector<8x1xi32>
    %20 = arith.cmpi slt, %18, %19 : vector<8x1xi32>
    %21 = arith.andi %16, %20 : vector<8x1xi1>
    %cst_7 = arith.constant 0.000000e+00 : f32
    %22 = vector.shape_cast %21 : vector<8x1xi1> to vector<8x1xi1>
    %23 = vector.broadcast %22 : vector<8x1xi1> to vector<8x128xi1>
    %24 = vector.broadcast %cst_7 : f32 to vector<8x128xf32>
    %25 = arith.select %23, %12, %24 : vector<8x128xi1>, vector<8x128xf32>
    %cst_8 = arith.constant dense<0.000000e+00> : vector<128xf32>
    %26 = vector.multi_reduction <add>, %25, %cst_8 [0] : vector<8x128xf32> to vector<128xf32>
    %27 = vector.shape_cast %26 : vector<128xf32> to vector<1x128xf32>
    %28 = arith.addf %7, %27 : vector<1x128xf32>
    %29 = arith.mulf %25, %25 : vector<8x128xf32>
    %cst_9 = arith.constant dense<0.000000e+00> : vector<128xf32>
    %30 = vector.multi_reduction <add>, %29, %cst_9 [0] : vector<8x128xf32> to vector<128xf32>
    %31 = vector.shape_cast %30 : vector<128xf32> to vector<1x128xf32>
    %32 = arith.addf %8, %31 : vector<1x128xf32>
    %c0_10 = arith.constant 0 : index
    %c4 = arith.constant 4 : index
    %33 = vector.load %arg1[%c0_10, %c4] : memref<8x256xbf16, #tpu.memory_space<vmem>>, vector<8x52xbf16>
    %c0_11 = arith.constant 0 : index
    %c132 = arith.constant 132 : index
    %34 = vector.load %arg1[%c0_11, %c132] : memref<8x256xbf16, #tpu.memory_space<vmem>>, vector<8x52xbf16>
    %35 = tpu.concatenate %33, %34 in 1 : vector<8x52xbf16>, vector<8x52xbf16> -> vector<8x104xbf16>
    %cst_12 = arith.constant dense<0.000000e+00> : vector<8x128xf32>
    %36 = tpu.matmul %35, %6, %cst_12 {dimension_numbers = #tpu.dot_dimension_numbers<[1], [0], [0], [1], [0, 0, 1, 1], [], []>} : vector<8x104xbf16>, vector<104x128xbf16>, vector<8x128xf32> -> vector<8x128xf32>
    %c1_i32 = arith.constant 1 : i32
    %37 = vector.broadcast %c1_i32 : i32 to vector<8x1xi32>
    %38 = arith.addi %5, %37 : vector<8x1xi32>
    %c4_i32_13 = arith.constant 4 : i32
    %39 = vector.broadcast %c4_i32_13 : i32 to vector<8x1xi32>
    %40 = arith.cmpi sge, %38, %39 : vector<8x1xi32>
    %c1_i32_14 = arith.constant 1 : i32
    %41 = vector.broadcast %c1_i32_14 : i32 to vector<8x1xi32>
    %42 = arith.addi %5, %41 : vector<8x1xi32>
    %c20_i32_15 = arith.constant 20 : i32
    %43 = vector.broadcast %c20_i32_15 : i32 to vector<8x1xi32>
    %44 = arith.cmpi slt, %42, %43 : vector<8x1xi32>
    %45 = arith.andi %40, %44 : vector<8x1xi1>
    %cst_16 = arith.constant 0.000000e+00 : f32
    %46 = vector.shape_cast %45 : vector<8x1xi1> to vector<8x1xi1>
    %47 = vector.broadcast %46 : vector<8x1xi1> to vector<8x128xi1>
    %48 = vector.broadcast %cst_16 : f32 to vector<8x128xf32>
    %49 = arith.select %47, %36, %48 : vector<8x128xi1>, vector<8x128xf32>
    %cst_17 = arith.constant dense<0.000000e+00> : vector<128xf32>
    %50 = vector.multi_reduction <add>, %49, %cst_17 [0] : vector<8x128xf32> to vector<128xf32>
    %51 = vector.shape_cast %50 : vector<128xf32> to vector<1x128xf32>
    %52 = arith.addf %28, %51 : vector<1x128xf32>
    %53 = arith.mulf %49, %49 : vector<8x128xf32>
    %cst_18 = arith.constant dense<0.000000e+00> : vector<128xf32>
    %54 = vector.multi_reduction <add>, %53, %cst_18 [0] : vector<8x128xf32> to vector<128xf32>
    %55 = vector.shape_cast %54 : vector<128xf32> to vector<1x128xf32>
    %56 = arith.addf %32, %55 : vector<1x128xf32>
    %c0_19 = arith.constant 0 : index
    %c8 = arith.constant 8 : index
    %57 = vector.load %arg1[%c0_19, %c8] : memref<8x256xbf16, #tpu.memory_space<vmem>>, vector<8x52xbf16>
    %c0_20 = arith.constant 0 : index
    %c136 = arith.constant 136 : index
    %58 = vector.load %arg1[%c0_20, %c136] : memref<8x256xbf16, #tpu.memory_space<vmem>>, vector<8x52xbf16>
    %59 = tpu.concatenate %57, %58 in 1 : vector<8x52xbf16>, vector<8x52xbf16> -> vector<8x104xbf16>
    %cst_21 = arith.constant dense<0.000000e+00> : vector<8x128xf32>
    %60 = tpu.matmul %59, %6, %cst_21 {dimension_numbers = #tpu.dot_dimension_numbers<[1], [0], [0], [1], [0, 0, 1, 1], [], []>} : vector<8x104xbf16>, vector<104x128xbf16>, vector<8x128xf32> -> vector<8x128xf32>
    %c2_i32 = arith.constant 2 : i32
    %61 = vector.broadcast %c2_i32 : i32 to vector<8x1xi32>
    %62 = arith.addi %5, %61 : vector<8x1xi32>
    %c4_i32_22 = arith.constant 4 : i32
    %63 = vector.broadcast %c4_i32_22 : i32 to vector<8x1xi32>
    %64 = arith.cmpi sge, %62, %63 : vector<8x1xi32>
    %c2_i32_23 = arith.constant 2 : i32
    %65 = vector.broadcast %c2_i32_23 : i32 to vector<8x1xi32>
    %66 = arith.addi %5, %65 : vector<8x1xi32>
    %c20_i32_24 = arith.constant 20 : i32
    %67 = vector.broadcast %c20_i32_24 : i32 to vector<8x1xi32>
    %68 = arith.cmpi slt, %66, %67 : vector<8x1xi32>
    %69 = arith.andi %64, %68 : vector<8x1xi1>
    %cst_25 = arith.constant 0.000000e+00 : f32
    %70 = vector.shape_cast %69 : vector<8x1xi1> to vector<8x1xi1>
    %71 = vector.broadcast %70 : vector<8x1xi1> to vector<8x128xi1>
    %72 = vector.broadcast %cst_25 : f32 to vector<8x128xf32>
    %73 = arith.select %71, %60, %72 : vector<8x128xi1>, vector<8x128xf32>
    %cst_26 = arith.constant dense<0.000000e+00> : vector<128xf32>
    %74 = vector.multi_reduction <add>, %73, %cst_26 [0] : vector<8x128xf32> to vector<128xf32>
    %75 = vector.shape_cast %74 : vector<128xf32> to vector<1x128xf32>
    %76 = arith.addf %52, %75 : vector<1x128xf32>
    %77 = arith.mulf %73, %73 : vector<8x128xf32>
    %cst_27 = arith.constant dense<0.000000e+00> : vector<128xf32>
    %78 = vector.multi_reduction <add>, %77, %cst_27 [0] : vector<8x128xf32> to vector<128xf32>
    %79 = vector.shape_cast %78 : vector<128xf32> to vector<1x128xf32>
    %80 = arith.addf %56, %79 : vector<1x128xf32>
    %c0_28 = arith.constant 0 : index
    %c12 = arith.constant 12 : index
    %81 = vector.load %arg1[%c0_28, %c12] : memref<8x256xbf16, #tpu.memory_space<vmem>>, vector<8x52xbf16>
    %c0_29 = arith.constant 0 : index
    %c140 = arith.constant 140 : index
    %82 = vector.load %arg1[%c0_29, %c140] : memref<8x256xbf16, #tpu.memory_space<vmem>>, vector<8x52xbf16>
    %83 = tpu.concatenate %81, %82 in 1 : vector<8x52xbf16>, vector<8x52xbf16> -> vector<8x104xbf16>
    %cst_30 = arith.constant dense<0.000000e+00> : vector<8x128xf32>
    %84 = tpu.matmul %83, %6, %cst_30 {dimension_numbers = #tpu.dot_dimension_numbers<[1], [0], [0], [1], [0, 0, 1, 1], [], []>} : vector<8x104xbf16>, vector<104x128xbf16>, vector<8x128xf32> -> vector<8x128xf32>
    %c3_i32 = arith.constant 3 : i32
    %85 = vector.broadcast %c3_i32 : i32 to vector<8x1xi32>
    %86 = arith.addi %5, %85 : vector<8x1xi32>
    %c4_i32_31 = arith.constant 4 : i32
    %87 = vector.broadcast %c4_i32_31 : i32 to vector<8x1xi32>
    %88 = arith.cmpi sge, %86, %87 : vector<8x1xi32>
    %c3_i32_32 = arith.constant 3 : i32
    %89 = vector.broadcast %c3_i32_32 : i32 to vector<8x1xi32>
    %90 = arith.addi %5, %89 : vector<8x1xi32>
    %c20_i32_33 = arith.constant 20 : i32
    %91 = vector.broadcast %c20_i32_33 : i32 to vector<8x1xi32>
    %92 = arith.cmpi slt, %90, %91 : vector<8x1xi32>
    %93 = arith.andi %88, %92 : vector<8x1xi1>
    %cst_34 = arith.constant 0.000000e+00 : f32
    %94 = vector.shape_cast %93 : vector<8x1xi1> to vector<8x1xi1>
    %95 = vector.broadcast %94 : vector<8x1xi1> to vector<8x128xi1>
    %96 = vector.broadcast %cst_34 : f32 to vector<8x128xf32>
    %97 = arith.select %95, %84, %96 : vector<8x128xi1>, vector<8x128xf32>
    %cst_35 = arith.constant dense<0.000000e+00> : vector<128xf32>
    %98 = vector.multi_reduction <add>, %97, %cst_35 [0] : vector<8x128xf32> to vector<128xf32>
    %99 = vector.shape_cast %98 : vector<128xf32> to vector<1x128xf32>
    %100 = arith.addf %76, %99 : vector<1x128xf32>
    %101 = arith.mulf %97, %97 : vector<8x128xf32>
    %cst_36 = arith.constant dense<0.000000e+00> : vector<128xf32>
    %102 = vector.multi_reduction <add>, %101, %cst_36 [0] : vector<8x128xf32> to vector<128xf32>
    %103 = vector.shape_cast %102 : vector<128xf32> to vector<1x128xf32>
    %104 = arith.addf %80, %103 : vector<1x128xf32>
    %c0_37 = arith.constant 0 : index
    %c16 = arith.constant 16 : index
    %105 = vector.load %arg1[%c0_37, %c16] : memref<8x256xbf16, #tpu.memory_space<vmem>>, vector<8x52xbf16>
    %c0_38 = arith.constant 0 : index
    %c144 = arith.constant 144 : index
    %106 = vector.load %arg1[%c0_38, %c144] : memref<8x256xbf16, #tpu.memory_space<vmem>>, vector<8x52xbf16>
    %107 = tpu.concatenate %105, %106 in 1 : vector<8x52xbf16>, vector<8x52xbf16> -> vector<8x104xbf16>
    %cst_39 = arith.constant dense<0.000000e+00> : vector<8x128xf32>
    %108 = tpu.matmul %107, %6, %cst_39 {dimension_numbers = #tpu.dot_dimension_numbers<[1], [0], [0], [1], [0, 0, 1, 1], [], []>} : vector<8x104xbf16>, vector<104x128xbf16>, vector<8x128xf32> -> vector<8x128xf32>
    %c4_i32_40 = arith.constant 4 : i32
    %109 = vector.broadcast %c4_i32_40 : i32 to vector<8x1xi32>
    %110 = arith.addi %5, %109 : vector<8x1xi32>
    %c4_i32_41 = arith.constant 4 : i32
    %111 = vector.broadcast %c4_i32_41 : i32 to vector<8x1xi32>
    %112 = arith.cmpi sge, %110, %111 : vector<8x1xi32>
    %c4_i32_42 = arith.constant 4 : i32
    %113 = vector.broadcast %c4_i32_42 : i32 to vector<8x1xi32>
    %114 = arith.addi %5, %113 : vector<8x1xi32>
    %c20_i32_43 = arith.constant 20 : i32
    %115 = vector.broadcast %c20_i32_43 : i32 to vector<8x1xi32>
    %116 = arith.cmpi slt, %114, %115 : vector<8x1xi32>
    %117 = arith.andi %112, %116 : vector<8x1xi1>
    %cst_44 = arith.constant 0.000000e+00 : f32
    %118 = vector.shape_cast %117 : vector<8x1xi1> to vector<8x1xi1>
    %119 = vector.broadcast %118 : vector<8x1xi1> to vector<8x128xi1>
    %120 = vector.broadcast %cst_44 : f32 to vector<8x128xf32>
    %121 = arith.select %119, %108, %120 : vector<8x128xi1>, vector<8x128xf32>
    %cst_45 = arith.constant dense<0.000000e+00> : vector<128xf32>
    %122 = vector.multi_reduction <add>, %121, %cst_45 [0] : vector<8x128xf32> to vector<128xf32>
    %123 = vector.shape_cast %122 : vector<128xf32> to vector<1x128xf32>
    %124 = arith.addf %100, %123 : vector<1x128xf32>
    %125 = arith.mulf %121, %121 : vector<8x128xf32>
    %cst_46 = arith.constant dense<0.000000e+00> : vector<128xf32>
    %126 = vector.multi_reduction <add>, %125, %cst_46 [0] : vector<8x128xf32> to vector<128xf32>
    %127 = vector.shape_cast %126 : vector<128xf32> to vector<1x128xf32>
    %128 = arith.addf %104, %127 : vector<1x128xf32>
    %c0_47 = arith.constant 0 : index
    %c20 = arith.constant 20 : index
    %129 = vector.load %arg1[%c0_47, %c20] : memref<8x256xbf16, #tpu.memory_space<vmem>>, vector<8x52xbf16>
    %c0_48 = arith.constant 0 : index
    %c148 = arith.constant 148 : index
    %130 = vector.load %arg1[%c0_48, %c148] : memref<8x256xbf16, #tpu.memory_space<vmem>>, vector<8x52xbf16>
    %131 = tpu.concatenate %129, %130 in 1 : vector<8x52xbf16>, vector<8x52xbf16> -> vector<8x104xbf16>
    %cst_49 = arith.constant dense<0.000000e+00> : vector<8x128xf32>
    %132 = tpu.matmul %131, %6, %cst_49 {dimension_numbers = #tpu.dot_dimension_numbers<[1], [0], [0], [1], [0, 0, 1, 1], [], []>} : vector<8x104xbf16>, vector<104x128xbf16>, vector<8x128xf32> -> vector<8x128xf32>
    %c5_i32 = arith.constant 5 : i32
    %133 = vector.broadcast %c5_i32 : i32 to vector<8x1xi32>
    %134 = arith.addi %5, %133 : vector<8x1xi32>
    %c4_i32_50 = arith.constant 4 : i32
    %135 = vector.broadcast %c4_i32_50 : i32 to vector<8x1xi32>
    %136 = arith.cmpi sge, %134, %135 : vector<8x1xi32>
    %c5_i32_51 = arith.constant 5 : i32
    %137 = vector.broadcast %c5_i32_51 : i32 to vector<8x1xi32>
    %138 = arith.addi %5, %137 : vector<8x1xi32>
    %c20_i32_52 = arith.constant 20 : i32
    %139 = vector.broadcast %c20_i32_52 : i32 to vector<8x1xi32>
    %140 = arith.cmpi slt, %138, %139 : vector<8x1xi32>
    %141 = arith.andi %136, %140 : vector<8x1xi1>
    %cst_53 = arith.constant 0.000000e+00 : f32
    %142 = vector.shape_cast %141 : vector<8x1xi1> to vector<8x1xi1>
    %143 = vector.broadcast %142 : vector<8x1xi1> to vector<8x128xi1>
    %144 = vector.broadcast %cst_53 : f32 to vector<8x128xf32>
    %145 = arith.select %143, %132, %144 : vector<8x128xi1>, vector<8x128xf32>
    %cst_54 = arith.constant dense<0.000000e+00> : vector<128xf32>
    %146 = vector.multi_reduction <add>, %145, %cst_54 [0] : vector<8x128xf32> to vector<128xf32>
    %147 = vector.shape_cast %146 : vector<128xf32> to vector<1x128xf32>
    %148 = arith.addf %124, %147 : vector<1x128xf32>
    %149 = arith.mulf %145, %145 : vector<8x128xf32>
    %cst_55 = arith.constant dense<0.000000e+00> : vector<128xf32>
    %150 = vector.multi_reduction <add>, %149, %cst_55 [0] : vector<8x128xf32> to vector<128xf32>
    %151 = vector.shape_cast %150 : vector<128xf32> to vector<1x128xf32>
    %152 = arith.addf %128, %151 : vector<1x128xf32>
    %c0_56 = arith.constant 0 : index
    %c24 = arith.constant 24 : index
    %153 = vector.load %arg1[%c0_56, %c24] : memref<8x256xbf16, #tpu.memory_space<vmem>>, vector<8x52xbf16>
    %c0_57 = arith.constant 0 : index
    %c152 = arith.constant 152 : index
    %154 = vector.load %arg1[%c0_57, %c152] : memref<8x256xbf16, #tpu.memory_space<vmem>>, vector<8x52xbf16>
    %155 = tpu.concatenate %153, %154 in 1 : vector<8x52xbf16>, vector<8x52xbf16> -> vector<8x104xbf16>
    %cst_58 = arith.constant dense<0.000000e+00> : vector<8x128xf32>
    %156 = tpu.matmul %155, %6, %cst_58 {dimension_numbers = #tpu.dot_dimension_numbers<[1], [0], [0], [1], [0, 0, 1, 1], [], []>} : vector<8x104xbf16>, vector<104x128xbf16>, vector<8x128xf32> -> vector<8x128xf32>
    %c6_i32 = arith.constant 6 : i32
    %157 = vector.broadcast %c6_i32 : i32 to vector<8x1xi32>
    %158 = arith.addi %5, %157 : vector<8x1xi32>
    %c4_i32_59 = arith.constant 4 : i32
    %159 = vector.broadcast %c4_i32_59 : i32 to vector<8x1xi32>
    %160 = arith.cmpi sge, %158, %159 : vector<8x1xi32>
    %c6_i32_60 = arith.constant 6 : i32
    %161 = vector.broadcast %c6_i32_60 : i32 to vector<8x1xi32>
    %162 = arith.addi %5, %161 : vector<8x1xi32>
    %c20_i32_61 = arith.constant 20 : i32
    %163 = vector.broadcast %c20_i32_61 : i32 to vector<8x1xi32>
    %164 = arith.cmpi slt, %162, %163 : vector<8x1xi32>
    %165 = arith.andi %160, %164 : vector<8x1xi1>
    %cst_62 = arith.constant 0.000000e+00 : f32
    %166 = vector.shape_cast %165 : vector<8x1xi1> to vector<8x1xi1>
    %167 = vector.broadcast %166 : vector<8x1xi1> to vector<8x128xi1>
    %168 = vector.broadcast %cst_62 : f32 to vector<8x128xf32>
    %169 = arith.select %167, %156, %168 : vector<8x128xi1>, vector<8x128xf32>
    %cst_63 = arith.constant dense<0.000000e+00> : vector<128xf32>
    %170 = vector.multi_reduction <add>, %169, %cst_63 [0] : vector<8x128xf32> to vector<128xf32>
    %171 = vector.shape_cast %170 : vector<128xf32> to vector<1x128xf32>
    %172 = arith.addf %148, %171 : vector<1x128xf32>
    %173 = arith.mulf %169, %169 : vector<8x128xf32>
    %cst_64 = arith.constant dense<0.000000e+00> : vector<128xf32>
    %174 = vector.multi_reduction <add>, %173, %cst_64 [0] : vector<8x128xf32> to vector<128xf32>
    %175 = vector.shape_cast %174 : vector<128xf32> to vector<1x128xf32>
    %176 = arith.addf %152, %175 : vector<1x128xf32>
    %c0_65 = arith.constant 0 : index
    %c28 = arith.constant 28 : index
    %177 = vector.load %arg1[%c0_65, %c28] : memref<8x256xbf16, #tpu.memory_space<vmem>>, vector<8x52xbf16>
    %c0_66 = arith.constant 0 : index
    %c156 = arith.constant 156 : index
    %178 = vector.load %arg1[%c0_66, %c156] : memref<8x256xbf16, #tpu.memory_space<vmem>>, vector<8x52xbf16>
    %179 = tpu.concatenate %177, %178 in 1 : vector<8x52xbf16>, vector<8x52xbf16> -> vector<8x104xbf16>
    %cst_67 = arith.constant dense<0.000000e+00> : vector<8x128xf32>
    %180 = tpu.matmul %179, %6, %cst_67 {dimension_numbers = #tpu.dot_dimension_numbers<[1], [0], [0], [1], [0, 0, 1, 1], [], []>} : vector<8x104xbf16>, vector<104x128xbf16>, vector<8x128xf32> -> vector<8x128xf32>
    %c7_i32 = arith.constant 7 : i32
    %181 = vector.broadcast %c7_i32 : i32 to vector<8x1xi32>
    %182 = arith.addi %5, %181 : vector<8x1xi32>
    %c4_i32_68 = arith.constant 4 : i32
    %183 = vector.broadcast %c4_i32_68 : i32 to vector<8x1xi32>
    %184 = arith.cmpi sge, %182, %183 : vector<8x1xi32>
    %c7_i32_69 = arith.constant 7 : i32
    %185 = vector.broadcast %c7_i32_69 : i32 to vector<8x1xi32>
    %186 = arith.addi %5, %185 : vector<8x1xi32>
    %c20_i32_70 = arith.constant 20 : i32
    %187 = vector.broadcast %c20_i32_70 : i32 to vector<8x1xi32>
    %188 = arith.cmpi slt, %186, %187 : vector<8x1xi32>
    %189 = arith.andi %184, %188 : vector<8x1xi1>
    %cst_71 = arith.constant 0.000000e+00 : f32
    %190 = vector.shape_cast %189 : vector<8x1xi1> to vector<8x1xi1>
    %191 = vector.broadcast %190 : vector<8x1xi1> to vector<8x128xi1>
    %192 = vector.broadcast %cst_71 : f32 to vector<8x128xf32>
    %193 = arith.select %191, %180, %192 : vector<8x128xi1>, vector<8x128xf32>
    %cst_72 = arith.constant dense<0.000000e+00> : vector<128xf32>
    %194 = vector.multi_reduction <add>, %193, %cst_72 [0] : vector<8x128xf32> to vector<128xf32>
    %195 = vector.shape_cast %194 : vector<128xf32> to vector<1x128xf32>
    %196 = arith.addf %172, %195 : vector<1x128xf32>
    %197 = arith.mulf %193, %193 : vector<8x128xf32>
    %cst_73 = arith.constant dense<0.000000e+00> : vector<128xf32>
    %198 = vector.multi_reduction <add>, %197, %cst_73 [0] : vector<8x128xf32> to vector<128xf32>
    %199 = vector.shape_cast %198 : vector<128xf32> to vector<1x128xf32>
    %200 = arith.addf %176, %199 : vector<1x128xf32>
    %201 = tpu.concatenate %196, %200 in 0 : vector<1x128xf32>, vector<1x128xf32> -> vector<2x128xf32>
    %202 = vector.shape_cast %201 : vector<2x128xf32> to vector<1x2x128xf32>
    %c0_74 = arith.constant 0 : index
    %c0_75 = arith.constant 0 : index
    %c0_76 = arith.constant 0 : index
    %203 = vector.load %arg3[%c0_74, %c0_75, %c0_76] : memref<1x2x128xf32, #tpu.memory_space<vmem>>, vector<1x2x128xf32>
    tpu.vector_store %arg3[%c0_74, %c0_75, %c0_76], %202 {strides = array<i32>} : memref<1x2x128xf32, #tpu.memory_space<vmem>>, vector<1x2x128xf32>,
    return
  }
  func.func @transform_0(%arg0: i32) -> (i32, i32) {
    %c0_i32 = arith.constant 0 : i32
    %c0_i32_0 = arith.constant 0 : i32
    return %arg0, %c0_i32 : i32, i32
  }
  func.func @transform_1(%arg0: i32) -> (i32, i32) {
    %c0_i32 = arith.constant 0 : i32
    %c0_i32_0 = arith.constant 0 : i32
    %c0_i32_1 = arith.constant 0 : i32
    return %c0_i32, %c0_i32_0 : i32, i32
  }
  func.func @transform_2(%arg0: i32) -> (i32, i32, i32) {
    %c0_i32 = arith.constant 0 : i32
    %c0_i32_0 = arith.constant 0 : i32
    %c0_i32_1 = arith.constant 0 : i32
    return %arg0, %c0_i32, %c0_i32_0 : i32, i32, i32
  }
}

</mosaic_0001>

<bundles_post_ra>
// kernel: tpu_custom_call.1
= control target key start
LH: loop header
LB: loop body
LE: loop exit
PB: predicated region body
PF: predicated region fallthrough
CT: control target
= control target key end

     0   :  { %7 = vsyncpa [#allocation3], 0  ;;  %s1254_s0 = inlined_call_operand.hbm [shape: bf16[8,256], index: 0, kind: input, shape index: {}]   ;;  %s1255_s1 = inlined_call_operand.hbm [shape: bf16[104,128], index: 1, kind: input, shape index: {}]   ;;  %s1256_s2 = inlined_call_operand.hbm [shape: f32[1,2,128], index: 2, kind: output, shape index: {}]  }
   0x1   :  { %8 = vsyncpa [#allocation6], 0 }
   0x2   :  { %9 = vsyncpa [#allocation4], 0  ;;  %s1017_s9 = smov [#allocation2]   ;;  %s1018_s11 = smov [#allocation5]  }
   0x3   :  { %s16_s10 = sshll.u32 %s1017_s9, 4  ;;  %s25_s12 = sshll.u32 %s1018_s11, 4  ;;  %s17_s10 = int_to_ptr.vmem [resolvable:$true] %s16_s10  ;;  %s26_s12 = int_to_ptr.vmem [resolvable:$true] %s25_s12 }
   0x4   :  { %s959_s13 = scalar_lea.vmem %s17_s10, 128  ;;  %p964_p1 = scmp.lt.s32.totalorder %s17_s10, %s17_s10 }
   0x5   :  { %p960_p0 = scmp.ne.s32.totalorder %s17_s10, %s959_s13  ;;  %p965_p2 = scmp.lt.s32.totalorder %s959_s13, %s959_s13 }
   0x7   :  { %p966_p3 = por %p965_p2, %p964_p1 }
   0x9   :  { %p967_p4 = pnand %p966_p3, %p960_p0 }
   0xb   :  { %970 = shalt.err (!%p967_p4)
}
   0xc   :  { %19 = dma.hbm_to_vmem [thread:$0]  %s1254_s0, 128, %s17_s10, [#allocation3]  }
   0xd   :  { %s979_s16 = scalar_lea.vmem %s26_s12, 832  ;;  %p984_p6 = scmp.lt.s32.totalorder %s26_s12, %s26_s12 }
   0xe   :  { %p980_p5 = scmp.ne.s32.totalorder %s26_s12, %s979_s16  ;;  %p985_p7 = scmp.lt.s32.totalorder %s979_s16, %s979_s16 }
  0x10   :  { %p986_p8 = por %p985_p7, %p984_p6 }
  0x12   :  { %p987_p9 = pnand %p986_p8, %p980_p5 }
  0x14   :  { %990 = shalt.err (!%p987_p9)
}
  0x15   :  { %s1019_s17 = smov 64   ;;  %s1020_s18 = smov 4  }
  0x16   :  { %31 = dma.hbm_to_vmem [thread:$0]  %s1255_s1, 832, %s26_s12, [#allocation6], %s1019_s17, %s1019_s17, %s1020_s18  }
  0x17   :  { %1011 = dma.done.wait [#allocation3], 128  }
  0x18   :  { %1012 = vsyncadd [#allocation3], 4294967168 }
  0x19   :  { %1013 = dma.done.wait [#allocation6], 832  }
  0x1a   :  { %1014 = vsyncadd [#allocation6], 4294966464  ;;  %v1021_v0 = vmov 0.0   ;;  %vm1022_vm0 = vmmov 0   ;;  %vm111_vm1 = vcmask 1043456   ;;  %s1023_s0 = smov 52   ;;  %v40_v35 = vlaneseq }
  0x1b   :  { %776 = vmatprep.subr.bf16.mxu0 %v1021_v0  ;;  %794 = vmatprep.subr.bf16.mxu1 %v1021_v0  ;;  %v1066_v1 = vld [vmem:[#allocation2 + $0x4] ss:$0 sps:$4 sm:$0xff]   ;;  %v1068_v2 = vld [vmem:[#allocation2] sm:$0xf]  ;;  %v944_v3 = vld [vmem:[#allocation5 + $0x30] ss:$0 sps:$4 sm:$0xff]  }
  0x1c   :  { %790 = vmatprep.mubr.msk.bf16.mxu0 %vm1022_vm0, %v1021_v0  ;;  %808 = vmatprep.mubr.msk.bf16.mxu1 %vm1022_vm0, %v1021_v0  ;;  %s1024_s1 = smov 48   ;;  %v704_v4 = vcombine.low %v1068_v2, %v1068_v2  ;;  %v1074_v5 = vsel %vm111_vm1, %v944_v3, 0  ;;  %v1077_v6 = vld [vmem:[#allocation5 + $0x28] sm:$0xff]   ;;  %s1025_s21 = smov 124   ;;  %v1083_v7 = vld [vmem:[#allocation5 + $0x20] sm:$0xff]   ;;  %v1090_v8 = vld [vmem:[#allocation5 + $0x18] sm:$0xff]  }
  0x1d   :  { %63 = vrot.lane.b32.xlu0 %v1066_v1, %s1023_s0  ;;  %181 = vrot.lane.b32.xlu1 %v1066_v1, %s1024_s1  ;;  %s1026_s22 = smov 120   ;;  %s1027_s23 = smov 44   ;;  %v1097_v9 = vld [vmem:[#allocation5 + $0x10] sm:$0xff]   ;;  %v1104_v10 = vld [vmem:[#allocation5 + $0x8] sm:$0xff]   ;;  %v1111_v11 = vld [vmem:[#allocation5] sm:$0xff]   ;;  %vm65_vm2 = vcmask 424960  }
  0x1e   :  { %777 = vmatpush3.bf16.msra.mxu0 %v1074_v5  ;;  %795 = vmatpush3.bf16.msra.mxu1 %v1074_v5  ;;  %s1028_s24 = smov 116   ;;  %s1029_s25 = smov 40   ;;  %vm108_vm3 = vcmask 850944   ;;  %v41_v36 = vshrl.u32 %v40_v35, 7 }
  0x1f   :  { %778 = vmatprep.subr.bf16.mxu0 %v1021_v0  ;;  %796 = vmatprep.subr.bf16.mxu1 %v1021_v0  ;;  %s1030_s26 = smov 112   ;;  %s1031_s27 = smov 36  }
  0x20   :  { %s1032_s28 = smov 108   ;;  %s1033_s29 = smov 32   ;;  %v1233_v37 = vmul.u32 8, %v41_v36 }
  0x21   :  { %179 = vrot.lane.b32.xlu0 %v704_v4, %s1025_s21  ;;  %250 = vrot.lane.b32.xlu1 %v704_v4, %s1026_s22  ;;  %s1034_s30 = smov 104   ;;  %s1035_s3 = smov 28  }
  0x22   :  { %779 = vmatpush3.bf16.msra.mxu0 %v1077_v6  ;;  %797 = vmatpush3.bf16.msra.mxu1 %v1077_v6  ;;  %s1036_s4 = smov 100   ;;  %s1037_s5 = smov 24   ;;  %vm155_vm4 = vcmp.ge.s32.totalorder %v1233_v37, 4  ;;  %vm156_vm5 = vcmp.lt.s32.totalorder %v1233_v37, 20  ;;  %v228_v38 = vadd.s32 1, %v1233_v37 }
  0x23   :  { %780 = vmatprep.subr.bf16.mxu0 %v1021_v0  ;;  %798 = vmatprep.subr.bf16.mxu1 %v1021_v0  ;;  %vm157_vm6 = vmand %vm155_vm4, %vm156_vm5  ;;  %s1038_s6 = smov [#allocation7]  }
  0x24   :  { %vm229_vm7 = vcmp.ge.s32.totalorder %v228_v38, 4  ;;  %vm230_vm8 = vcmp.lt.s32.totalorder %v228_v38, 20  ;;  %s685_s7 = sshll.u32 %s1038_s6, 4  ;;  %s686_s7 = int_to_ptr.vmem [resolvable:$true] %s685_s7 }
  0x25   :  { %252 = vrot.lane.b32.xlu0 %v1066_v1, %s1027_s23  ;;  %321 = vrot.lane.b32.xlu1 %v704_v4, %s1028_s24  ;;  %vm231_vm9 = vmand %vm229_vm7, %vm230_vm8  ;;  %s991_s8 = scalar_lea.vmem %s686_s7, 32  ;;  %p996_p11 = scmp.lt.s32.totalorder %s686_s7, %s686_s7 }
  0x26   :  { %781 = vmatpush3.bf16.msra.mxu0 %v1083_v7  ;;  %799 = vmatpush3.bf16.msra.mxu1 %v1083_v7  ;;  %p992_p10 = scmp.ne.s32.totalorder %s686_s7, %s991_s8  ;;  %p997_p12 = scmp.lt.s32.totalorder %s991_s8, %s991_s8 }
  0x27   :  { %782 = vmatprep.subr.bf16.mxu0 %v1021_v0  ;;  %800 = vmatprep.subr.bf16.mxu1 %v1021_v0 }
  0x28   :  { %p998_p13 = por %p997_p12, %p996_p11 }
  0x29   :  { %323 = vrot.lane.b32.xlu0 %v1066_v1, %s1029_s25  ;;  %392 = vrot.lane.b32.xlu1 %v704_v4, %s1030_s26 }
  0x2a   :  { %783 = vmatpush3.bf16.msra.mxu0 %v1090_v8  ;;  %801 = vmatpush3.bf16.msra.mxu1 %v1090_v8  ;;  %p999_p0 = pnand %p998_p13, %p992_p10 }
  0x2b   :  { %784 = vmatprep.subr.bf16.mxu0 %v1021_v0  ;;  %802 = vmatprep.subr.bf16.mxu1 %v1021_v0 }
  0x2d   :  { %394 = vrot.lane.b32.xlu0 %v1066_v1, %s1031_s27  ;;  %463 = vrot.lane.b32.xlu1 %v704_v4, %s1032_s28 }
  0x2e   :  { %785 = vmatpush3.bf16.msra.mxu0 %v1097_v9  ;;  %803 = vmatpush3.bf16.msra.mxu1 %v1097_v9 }
  0x2f   :  { %786 = vmatprep.subr.bf16.mxu0 %v1021_v0  ;;  %804 = vmatprep.subr.bf16.mxu1 %v1021_v0 }
  0x31   :  { %465 = vrot.lane.b32.xlu0 %v1066_v1, %s1033_s29  ;;  %534 = vrot.lane.b32.xlu1 %v704_v4, %s1034_s30 }
  0x32   :  { %787 = vmatpush3.bf16.msra.mxu0 %v1104_v10  ;;  %805 = vmatpush3.bf16.msra.mxu1 %v1104_v10 }
  0x33   :  { %788 = vmatprep.subr.bf16.mxu0 %v1021_v0  ;;  %806 = vmatprep.subr.bf16.mxu1 %v1021_v0 }
  0x35   :  { %536 = vrot.lane.b32.xlu0 %v1066_v1, %s1035_s3  ;;  %605 = vrot.lane.b32.xlu1 %v704_v4, %s1036_s4 }
  0x36   :  { %789 = vmatpush3.bf16.msra.mxu0 %v1111_v11  ;;  %807 = vmatpush3.bf16.msra.mxu1 %v1111_v11 }
  0x37   :  { %812 = vmatprep.subr.bf16.mxu0 %v1021_v0  ;;  %830 = vmatprep.subr.bf16.mxu1 %v1021_v0 }
  0x39   :  { %607 = vrot.lane.b32.xlu0 %v1066_v1, %s1037_s5 }
  0x8f   :  { %v64_v12 = vpop.permute.xlu0 %63  ;;  %v182_v14 = vpop.permute.xlu1 %181 }
  0x90   :  { %v68_v13 = vsel %vm65_vm2, %v1068_v2, %v64_v12 }
  0x91   :  { %791 = vmatmul.mubr.msk.bf16.vlgmr.msra.gmra.mxu0 %vm108_vm3, %v68_v13 }
  0x92   :  { %813 = vmatpush3.bf16.msra.mxu0 %v1074_v5  ;;  %826 = vmatprep.mubr.msk.bf16.mxu0 %vm1022_vm0, %v1021_v0 }
  0x93   :  { %v180_v15 = vpop.permute.xlu0 %179  ;;  %814 = vmatprep.subr.bf16.mxu0 %v1021_v0  ;;  %v251_v17 = vpop.permute.xlu1 %250 }
  0x94   :  { %v185_v16 = vsel %vm65_vm2, %v180_v15, %v182_v14 }
  0x95   :  { %809 = vmatmul.mubr.msk.bf16.vlgmr.msra.gmra.mxu1 %vm108_vm3, %v185_v16 }
  0x96   :  { %815 = vmatpush3.bf16.msra.mxu0 %v1077_v6  ;;  %831 = vmatpush3.bf16.msra.mxu1 %v1074_v5 }
  0x97   :  { %816 = vmatprep.subr.bf16.mxu0 %v1021_v0  ;;  %832 = vmatprep.subr.bf16.mxu1 %v1021_v0  ;;  %v253_v18 = vpop.permute.xlu0 %252  ;;  %v322_v20 = vpop.permute.xlu1 %321 }
  0x98   :  { %844 = vmatprep.mubr.msk.bf16.mxu1 %vm1022_vm0, %v1021_v0  ;;  %v256_v19 = vsel %vm65_vm2, %v251_v17, %v253_v18 }
  0x9a   :  { %817 = vmatpush3.bf16.msra.mxu0 %v1083_v7  ;;  %833 = vmatpush3.bf16.msra.mxu1 %v1077_v6 }
  0x9b   :  { %818 = vmatprep.subr.bf16.mxu0 %v1021_v0  ;;  %834 = vmatprep.subr.bf16.mxu1 %v1021_v0  ;;  %v324_v21 = vpop.permute.xlu0 %323  ;;  %v393_v23 = vpop.permute.xlu1 %392 }
  0x9c   :  { %v327_v22 = vsel %vm65_vm2, %v322_v20, %v324_v21  ;;  %v299_v21 = vadd.s32 2, %v1233_v37 }
  0x9e   :  { %819 = vmatpush3.bf16.msra.mxu0 %v1090_v8  ;;  %835 = vmatpush3.bf16.msra.mxu1 %v1083_v7  ;;  %vm300_vm10 = vcmp.ge.s32.totalorder %v299_v21, 4  ;;  %vm301_vm11 = vcmp.lt.s32.totalorder %v299_v21, 20 }
  0x9f   :  { %820 = vmatprep.subr.bf16.mxu0 %v1021_v0  ;;  %836 = vmatprep.subr.bf16.mxu1 %v1021_v0  ;;  %v395_v24 = vpop.permute.xlu0 %394  ;;  %v464_v26 = vpop.permute.xlu1 %463  ;;  %vm302_vm14 = vmand %vm300_vm10, %vm301_vm11 }
  0xa0   :  { %v398_v25 = vsel %vm65_vm2, %v393_v23, %v395_v24  ;;  %v441_v24 = vadd.s32 4, %v1233_v37 }
  0xa2   :  { %821 = vmatpush3.bf16.msra.mxu0 %v1097_v9  ;;  %837 = vmatpush3.bf16.msra.mxu1 %v1090_v8  ;;  %vm442_vm15 = vcmp.ge.s32.totalorder %v441_v24, 4 }
  0xa3   :  { %822 = vmatprep.subr.bf16.mxu0 %v1021_v0  ;;  %838 = vmatprep.subr.bf16.mxu1 %v1021_v0  ;;  %v466_v27 = vpop.permute.xlu0 %465  ;;  %v535_v29 = vpop.permute.xlu1 %534 }
  0xa4   :  { %v469_v28 = vsel %vm65_vm2, %v464_v26, %v466_v27  ;;  %v512_v26 = vadd.s32 5, %v1233_v37 }
  0xa6   :  { %823 = vmatpush3.bf16.msra.mxu0 %v1104_v10  ;;  %839 = vmatpush3.bf16.msra.mxu1 %v1097_v9 }
  0xa7   :  { %824 = vmatprep.subr.bf16.mxu0 %v1021_v0  ;;  %840 = vmatprep.subr.bf16.mxu1 %v1021_v0  ;;  %v537_v30 = vpop.permute.xlu0 %536  ;;  %v606_v32 = vpop.permute.xlu1 %605 }
  0xa8   :  { %v540_v31 = vsel %vm65_vm2, %v535_v29, %v537_v30 }
  0xaa   :  { %825 = vmatpush3.bf16.msra.mxu0 %v1111_v11  ;;  %841 = vmatpush3.bf16.msra.mxu1 %v1104_v10 }
  0xab   :  { %842 = vmatprep.subr.bf16.mxu1 %v1021_v0  ;;  %848 = vmatprep.subr.bf16.mxu0 %v1021_v0  ;;  %v608_v33 = vpop.permute.xlu0 %607 }
  0xac   :  { %v611_v34 = vsel %vm65_vm2, %v606_v32, %v608_v33  ;;  %vm513_vm2 = vcmp.ge.s32.totalorder %v512_v26, 4 }
  0xad   :  { %827 = vmatmul.mubr.msk.bf16.vlgmr.msra.gmra.mxu0 %vm108_vm3, %v256_v19 }
  0xae   :  { %843 = vmatpush3.bf16.msra.mxu1 %v1111_v11  ;;  %849 = vmatpush3.bf16.msra.mxu0 %v1074_v5 }
  0xaf   :  { %850 = vmatprep.subr.bf16.mxu0 %v1021_v0  ;;  %866 = vmatprep.subr.bf16.mxu1 %v1021_v0 }
  0xb0   :  { %862 = vmatprep.mubr.msk.bf16.mxu0 %vm1022_vm0, %v1021_v0 }
  0xb1   :  { %845 = vmatmul.mubr.msk.bf16.vlgmr.msra.gmra.mxu1 %vm108_vm3, %v327_v22  ;;  %v370_v22 = vadd.s32 3, %v1233_v37 }
  0xb2   :  { %851 = vmatpush3.bf16.msra.mxu0 %v1077_v6  ;;  %867 = vmatpush3.bf16.msra.mxu1 %v1074_v5 }
  0xb3   :  { %852 = vmatprep.subr.bf16.mxu0 %v1021_v0  ;;  %868 = vmatprep.subr.bf16.mxu1 %v1021_v0  ;;  %vm371_vm12 = vcmp.ge.s32.totalorder %v370_v22, 4  ;;  %vm372_vm13 = vcmp.lt.s32.totalorder %v370_v22, 20 }
  0xb4   :  { %880 = vmatprep.mubr.msk.bf16.mxu1 %vm1022_vm0, %v1021_v0  ;;  %vm373_vm1 = vmand %vm371_vm12, %vm372_vm13  ;;  %vm676_vm12 = vcmask 1040384  }
  0xb6   :  { %853 = vmatpush3.bf16.msra.mxu0 %v1083_v7  ;;  %869 = vmatpush3.bf16.msra.mxu1 %v1077_v6 }
  0xb7   :  { %854 = vmatprep.subr.bf16.mxu0 %v1021_v0  ;;  %870 = vmatprep.subr.bf16.mxu1 %v1021_v0 }
  0xba   :  { %855 = vmatpush3.bf16.msra.mxu0 %v1090_v8  ;;  %871 = vmatpush3.bf16.msra.mxu1 %v1083_v7 }
  0xbb   :  { %856 = vmatprep.subr.bf16.mxu0 %v1021_v0  ;;  %872 = vmatprep.subr.bf16.mxu1 %v1021_v0 }
  0xbe   :  { %857 = vmatpush3.bf16.msra.mxu0 %v1097_v9  ;;  %873 = vmatpush3.bf16.msra.mxu1 %v1090_v8 }
  0xbf   :  { %858 = vmatprep.subr.bf16.mxu0 %v1021_v0  ;;  %874 = vmatprep.subr.bf16.mxu1 %v1021_v0 }
  0xc2   :  { %859 = vmatpush3.bf16.msra.mxu0 %v1104_v10  ;;  %875 = vmatpush3.bf16.msra.mxu1 %v1097_v9 }
  0xc3   :  { %860 = vmatprep.subr.bf16.mxu0 %v1021_v0  ;;  %876 = vmatprep.subr.bf16.mxu1 %v1021_v0 }
  0xc6   :  { %861 = vmatpush3.bf16.msra.mxu0 %v1111_v11  ;;  %877 = vmatpush3.bf16.msra.mxu1 %v1104_v10 }
  0xc7   :  { %878 = vmatprep.subr.bf16.mxu1 %v1021_v0  ;;  %884 = vmatprep.subr.bf16.mxu0 %v1021_v0 }
  0xc9   :  { %863 = vmatmul.mubr.msk.bf16.vlgmr.msra.gmra.mxu0 %vm108_vm3, %v398_v25 }
  0xca   :  { %879 = vmatpush3.bf16.msra.mxu1 %v1111_v11  ;;  %885 = vmatpush3.bf16.msra.mxu0 %v1074_v5 }
  0xcb   :  { %886 = vmatprep.subr.bf16.mxu0 %v1021_v0  ;;  %902 = vmatprep.subr.bf16.mxu1 %v1021_v0 }
  0xcc   :  { %898 = vmatprep.mubr.msk.bf16.mxu0 %vm1022_vm0, %v1021_v0 }
  0xcd   :  { %881 = vmatmul.mubr.msk.bf16.vlgmr.msra.gmra.mxu1 %vm108_vm3, %v469_v28 }
  0xce   :  { %887 = vmatpush3.bf16.msra.mxu0 %v1077_v6  ;;  %903 = vmatpush3.bf16.msra.mxu1 %v1074_v5 }
  0xcf   :  { %888 = vmatprep.subr.bf16.mxu0 %v1021_v0  ;;  %904 = vmatprep.subr.bf16.mxu1 %v1021_v0 }
  0xd0   :  { %916 = vmatprep.mubr.msk.bf16.mxu1 %vm1022_vm0, %v1021_v0  ;;  %vm443_vm0 = vcmp.lt.s32.totalorder %v441_v24, 20 }
  0xd1   :  { %vm444_vm4 = vmand %vm442_vm15, %vm443_vm0 }
  0xd2   :  { %889 = vmatpush3.bf16.msra.mxu0 %v1083_v7  ;;  %905 = vmatpush3.bf16.msra.mxu1 %v1077_v6 }
  0xd3   :  { %890 = vmatprep.subr.bf16.mxu0 %v1021_v0  ;;  %906 = vmatprep.subr.bf16.mxu1 %v1021_v0 }
  0xd6   :  { %891 = vmatpush3.bf16.msra.mxu0 %v1090_v8  ;;  %907 = vmatpush3.bf16.msra.mxu1 %v1083_v7 }
  0xd7   :  { %892 = vmatprep.subr.bf16.mxu0 %v1021_v0  ;;  %908 = vmatprep.subr.bf16.mxu1 %v1021_v0 }
  0xda   :  { %893 = vmatpush3.bf16.msra.mxu0 %v1097_v9  ;;  %909 = vmatpush3.bf16.msra.mxu1 %v1090_v8 }
  0xdb   :  { %894 = vmatprep.subr.bf16.mxu0 %v1021_v0  ;;  %910 = vmatprep.subr.bf16.mxu1 %v1021_v0 }
  0xde   :  { %895 = vmatpush3.bf16.msra.mxu0 %v1104_v10  ;;  %911 = vmatpush3.bf16.msra.mxu1 %v1097_v9 }
  0xdf   :  { %896 = vmatprep.subr.bf16.mxu0 %v1021_v0  ;;  %912 = vmatprep.subr.bf16.mxu1 %v1021_v0 }
  0xe2   :  { %897 = vmatpush3.bf16.msra.mxu0 %v1111_v11  ;;  %913 = vmatpush3.bf16.msra.mxu1 %v1104_v10 }
  0xe3   :  { %914 = vmatprep.subr.bf16.mxu1 %v1021_v0 }
  0xe5   :  { %899 = vmatmul.mubr.msk.bf16.vlgmr.msra.gmra.mxu0 %vm108_vm3, %v540_v31 }
  0xe6   :  { %915 = vmatpush3.bf16.msra.mxu1 %v1111_v11 }
  0xe9   :  { %917 = vmatmul.mubr.msk.bf16.vlgmr.msra.gmra.mxu1 %vm108_vm3, %v611_v34  ;;  %vm514_vm3 = vcmp.lt.s32.totalorder %v512_v26, 20 }
  0xea   :  { %vm515_vm5 = vmand %vm513_vm2, %vm514_vm3 }
 0x151   :  { %v149_v39 = vpop.f32.mrf.mxu0 }
 0x152   :  { %v160_v40 = vsel %vm157_vm6, %v149_v39, 0.0 }
 0x153   :  { %v161_v41 = vrot.slane %v160_v40, 4  ;;  %v168_v42 = vmul.f32 %v160_v40, %v160_v40  ;;  %v792_v43 = vpop.f32.mrf.mxu0 }
 0x155   :  { %v162_v44 = vadd.f32 %v161_v41, %v160_v40  ;;  %v169_v45 = vrot.slane %v168_v42, 4  ;;  %v152_v46 = vpop.f32.mrf.mxu0  ;;  %v222_v47 = vpop.f32.mrf.mxu1 }
 0x156   :  { %v234_v48 = vsel %vm231_vm9, %v222_v47, 0.0 }
 0x157   :  { %v163_v49 = vrot.slane %v162_v44, 2  ;;  %v170_v50 = vadd.f32 %v169_v45, %v168_v42  ;;  %v235_v51 = vrot.slane %v234_v48, 4  ;;  %v242_v52 = vmul.f32 %v234_v48, %v234_v48  ;;  %v793_v53 = vpop.f32.mrf.mxu0  ;;  %v810_v54 = vpop.f32.mrf.mxu1 }
 0x159   :  { %v164_v55 = vadd.f32 %v163_v49, %v162_v44  ;;  %v171_v56 = vrot.slane %v170_v50, 2  ;;  %v236_v57 = vadd.f32 %v235_v51, %v234_v48  ;;  %v243_v58 = vrot.slane %v242_v52, 4  ;;  %v225_v59 = vpop.f32.mrf.mxu1 }
 0x15a   :  { %v654_v59 = vadd.s32 7, %v1233_v37 }
 0x15b   :  { %v172_v60 = vadd.f32 %v171_v56, %v170_v50  ;;  %v237_v61 = vrot.slane %v236_v57, 2  ;;  %v244_v62 = vadd.f32 %v243_v58, %v242_v52  ;;  %v811_v63 = vpop.f32.mrf.mxu1  ;;  %v165_v0 = vrot.slane %v164_v55, 1 }
 0x15c   :  { %v583_v50 = vadd.s32 6, %v1233_v37  ;;  %vm655_vm9 = vcmp.ge.s32.totalorder %v654_v59, 4  ;;  %vm656_vm10 = vcmp.lt.s32.totalorder %v654_v59, 20 }
 0x15d   :  { %v238_v1 = vadd.f32 %v237_v61, %v236_v57  ;;  %v245_v2 = vrot.slane %v244_v62, 2  ;;  %v173_v3 = vrot.slane %v172_v60, 1  ;;  %v166_v6 = vadd.f32 %v165_v0, %v164_v55  ;;  %vm657_vm11 = vmand %vm655_vm9, %vm656_vm10 }
 0x15e   :  { %vm584_vm6 = vcmp.ge.s32.totalorder %v583_v50, 4  ;;  %vm585_vm7 = vcmp.lt.s32.totalorder %v583_v50, 20 }
 0x15f   :  { %v239_v4 = vrot.slane %v238_v1, 1  ;;  %v246_v5 = vadd.f32 %v245_v2, %v244_v62  ;;  %v174_v9 = vadd.f32 %v173_v3, %v172_v60  ;;  %vm586_vm8 = vmand %vm584_vm6, %vm585_vm7 }
 0x161   :  { %v240_v7 = vadd.f32 %v239_v4, %v238_v1  ;;  %v247_v8 = vrot.slane %v246_v5, 1 }
 0x163   :  { %v1238_v10 = vadd.f32 %v240_v7, %v166_v6  ;;  %v248_v11 = vadd.f32 %v247_v8, %v246_v5 }
 0x165   :  { %v1240_v12 = vadd.f32 %v248_v11, %v174_v9 }
 0x16d   :  { %v293_v13 = vpop.f32.mrf.mxu0 }
 0x16e   :  { %v305_v29 = vsel %vm302_vm14, %v293_v13, 0.0 }
 0x16f   :  { %v828_v14 = vpop.f32.mrf.mxu0  ;;  %v313_v34 = vmul.f32 %v305_v29, %v305_v29  ;;  %v306_v39 = vrot.slane %v305_v29, 4 }
 0x171   :  { %v296_v15 = vpop.f32.mrf.mxu0  ;;  %v364_v16 = vpop.f32.mrf.mxu1  ;;  %v314_v41 = vrot.slane %v313_v34, 4  ;;  %v307_v46 = vadd.f32 %v306_v39, %v305_v29 }
 0x172   :  { %v376_v32 = vsel %vm373_vm1, %v364_v16, 0.0 }
 0x173   :  { %v829_v17 = vpop.f32.mrf.mxu0  ;;  %v846_v18 = vpop.f32.mrf.mxu1  ;;  %v384_v38 = vmul.f32 %v376_v32, %v376_v32  ;;  %v377_v43 = vrot.slane %v376_v32, 4  ;;  %v315_v47 = vadd.f32 %v314_v41, %v313_v34  ;;  %v308_v55 = vrot.slane %v307_v46, 2 }
 0x175   :  { %v367_v19 = vpop.f32.mrf.mxu1  ;;  %v385_v44 = vrot.slane %v384_v38, 4  ;;  %v378_v51 = vadd.f32 %v377_v43, %v376_v32  ;;  %v316_v56 = vrot.slane %v315_v47, 2  ;;  %v309_v0 = vadd.f32 %v308_v55, %v307_v46 }
 0x177   :  { %v847_v20 = vpop.f32.mrf.mxu1  ;;  %v386_v52 = vadd.f32 %v385_v44, %v384_v38  ;;  %v379_v60 = vrot.slane %v378_v51, 2  ;;  %v317_v1 = vadd.f32 %v316_v56, %v315_v47  ;;  %v310_v8 = vrot.slane %v309_v0, 1 }
 0x179   :  { %v387_v61 = vrot.slane %v386_v52, 2  ;;  %v380_v4 = vadd.f32 %v379_v60, %v378_v51  ;;  %v318_v11 = vrot.slane %v317_v1, 1  ;;  %v311_v22 = vadd.f32 %v310_v8, %v309_v0 }
 0x17b   :  { %v388_v5 = vadd.f32 %v387_v61, %v386_v52  ;;  %v381_v18 = vrot.slane %v380_v4, 1  ;;  %v312_v47 = vadd.f32 %v311_v22, %v1238_v10 }
 0x17d   :  { %v389_v19 = vrot.slane %v388_v5, 1  ;;  %v382_v38 = vadd.f32 %v381_v18, %v380_v4 }
 0x17f   :  { %v390_v39 = vadd.f32 %v389_v19, %v388_v5  ;;  %v383_v56 = vadd.f32 %v382_v38, %v312_v47 }
 0x189   :  { %v435_v23 = vpop.f32.mrf.mxu0 }
 0x18a   :  { %v447_v35 = vsel %vm444_vm4, %v435_v23, 0.0 }
 0x18b   :  { %v864_v25 = vpop.f32.mrf.mxu0  ;;  %v455_v42 = vmul.f32 %v447_v35, %v447_v35  ;;  %v448_v48 = vrot.slane %v447_v35, 4 }
 0x18d   :  { %v438_v27 = vpop.f32.mrf.mxu0  ;;  %v506_v28 = vpop.f32.mrf.mxu1  ;;  %v456_v49 = vrot.slane %v455_v42, 4  ;;  %v449_v57 = vadd.f32 %v448_v48, %v447_v35 }
 0x18e   :  { %v518_v40 = vsel %vm515_vm5, %v506_v28, 0.0  ;;  %v319_v27 = vadd.f32 %v318_v11, %v317_v1 }
 0x18f   :  { %v865_v30 = vpop.f32.mrf.mxu0  ;;  %v882_v31 = vpop.f32.mrf.mxu1  ;;  %v526_v45 = vmul.f32 %v518_v40, %v518_v40  ;;  %v519_v53 = vrot.slane %v518_v40, 4  ;;  %v457_v58 = vadd.f32 %v456_v49, %v455_v42  ;;  %v450_v2 = vrot.slane %v449_v57, 2 }
 0x190   :  { %v320_v48 = vadd.f32 %v319_v27, %v1240_v12 }
 0x191   :  { %v509_v33 = vpop.f32.mrf.mxu1  ;;  %v527_v54 = vrot.slane %v526_v45, 4  ;;  %v520_v62 = vadd.f32 %v519_v53, %v518_v40  ;;  %v458_v3 = vrot.slane %v457_v58, 2  ;;  %v451_v13 = vadd.f32 %v450_v2, %v449_v57 }
 0x192   :  { %v391_v57 = vadd.f32 %v390_v39, %v320_v48 }
 0x193   :  { %v883_v36 = vpop.f32.mrf.mxu1  ;;  %v528_v63 = vadd.f32 %v527_v54, %v526_v45  ;;  %v521_v6 = vrot.slane %v520_v62, 2  ;;  %v459_v37 = vadd.f32 %v458_v3, %v457_v58  ;;  %v452_v28 = vrot.slane %v451_v13, 1 }
 0x195   :  { %v529_v7 = vrot.slane %v528_v63, 2  ;;  %v522_v20 = vadd.f32 %v521_v6, %v520_v62  ;;  %v460_v29 = vrot.slane %v459_v37, 1  ;;  %v453_v49 = vadd.f32 %v452_v28, %v451_v13 }
 0x197   :  { %v530_v21 = vadd.f32 %v529_v7, %v528_v63  ;;  %v523_v40 = vrot.slane %v522_v20, 1  ;;  %v461_v50 = vadd.f32 %v460_v29, %v459_v37  ;;  %v454_v63 = vadd.f32 %v453_v49, %v383_v56 }
 0x199   :  { %v531_v41 = vrot.slane %v530_v21, 1  ;;  %v524_v58 = vadd.f32 %v523_v40, %v522_v20  ;;  %v462_v0 = vadd.f32 %v461_v50, %v391_v57 }
 0x19b   :  { %v532_v59 = vadd.f32 %v531_v41, %v530_v21  ;;  %v525_v3 = vadd.f32 %v524_v58, %v454_v63 }
 0x19d   :  { %v533_v4 = vadd.f32 %v532_v59, %v462_v0 }
 0x1a5   :  { %v577_v9 = vpop.f32.mrf.mxu0 }
 0x1a6   :  { %v589_v14 = vsel %vm586_vm8, %v577_v9, 0.0 }
 0x1a7   :  { %v590_v15 = vrot.slane %v589_v14, 4  ;;  %v597_v16 = vmul.f32 %v589_v14, %v589_v14  ;;  %v900_v17 = vpop.f32.mrf.mxu0 }
 0x1a9   :  { %v591_v23 = vadd.f32 %v590_v15, %v589_v14  ;;  %v598_v24 = vrot.slane %v597_v16, 4  ;;  %v580_v25 = vpop.f32.mrf.mxu0  ;;  %v648_v26 = vpop.f32.mrf.mxu1 }
 0x1aa   :  { %v660_v30 = vsel %vm657_vm11, %v648_v26, 0.0 }
 0x1ab   :  { %v592_v31 = vrot.slane %v591_v23, 2  ;;  %v599_v32 = vadd.f32 %v598_v24, %v597_v16  ;;  %v661_v33 = vrot.slane %v660_v30, 4  ;;  %v668_v34 = vmul.f32 %v660_v30, %v660_v30  ;;  %v901_v35 = vpop.f32.mrf.mxu0  ;;  %v918_v36 = vpop.f32.mrf.mxu1 }
 0x1ad   :  { %v593_v42 = vadd.f32 %v592_v31, %v591_v23  ;;  %v600_v43 = vrot.slane %v599_v32, 2  ;;  %v662_v44 = vadd.f32 %v661_v33, %v660_v30  ;;  %v669_v45 = vrot.slane %v668_v34, 4  ;;  %v651_v46 = vpop.f32.mrf.mxu1 }
 0x1af   :  { %v594_v51 = vrot.slane %v593_v42, 1  ;;  %v601_v52 = vadd.f32 %v600_v43, %v599_v32  ;;  %v663_v53 = vrot.slane %v662_v44, 2  ;;  %v670_v54 = vadd.f32 %v669_v45, %v668_v34  ;;  %v919_v55 = vpop.f32.mrf.mxu1 }
 0x1b1   :  { %v602_v60 = vrot.slane %v601_v52, 1  ;;  %v664_v61 = vadd.f32 %v663_v53, %v662_v44  ;;  %v671_v62 = vrot.slane %v670_v54, 2  ;;  %v595_v1 = vadd.f32 %v594_v51, %v593_v42 }
 0x1b3   :  { %v603_v10 = vadd.f32 %v602_v60, %v601_v52  ;;  %v665_v2 = vrot.slane %v664_v61, 1  ;;  %v672_v12 = vadd.f32 %v671_v62, %v670_v54  ;;  %v596_v7 = vadd.f32 %v595_v1, %v525_v3 }
 0x1b5   :  { %v666_v5 = vadd.f32 %v665_v2, %v664_v61  ;;  %v673_v6 = vrot.slane %v672_v12, 1  ;;  %v604_v9 = vadd.f32 %v603_v10, %v533_v4 }
 0x1b7   :  { %v674_v8 = vadd.f32 %v673_v6, %v672_v12  ;;  %v667_v11 = vadd.f32 %v666_v5, %v596_v7 }
 0x1b9   :  { %v675_v13 = vadd.f32 %v674_v8, %v604_v9 }
 0x1bb   :  { %v677_v37 = vsel %vm676_vm12, %v667_v11, %v675_v13 }
 0x1bc   :  { %678 = vst [vmem:[#allocation7] sm:$0x3] %v677_v37 }
 0x1bd   :  { %1002 = shalt.err (!%p999_p0)
}
 0x1be   :  { %688 = dma.vmem_to_hbm [thread:$0]  %s686_s7, 32, %s1256_s2, [#allocation4]  }
 0x1bf   :  { %1015 = dma.done.wait [#allocation4], 32  }
 0x1c0   :  { %1016 = vsyncadd [#allocation4], 4294967264 }
 0x1c1   :  { %692 = vsyncpa [#allocation3], 1 }
 0x1c2   :  { %693 = vsyncpa [#allocation6], 1 }
 0x1c3   :  { %694 = vsyncpa [#allocation4], 1 }

</bundles_post_ra>
